<compile_context>
chip_gen: v7x
topology: tpu7x:2x2x1
jax: 0.10.0
libtpu: 0.0.40
codegen_flags: <defaults>
</compile_context>

<pallas_src>
import jax
import jax.numpy as jnp
from jax.experimental import pallas as pl
from jax.experimental.pallas import tpu as pltpu


_TARGET_BLOCK_BYTES = 4 * 1024 * 1024   # ~4 MiB/block; in+out double-buffered ~16 MiB
_VMEM_LIMIT_BYTES = 48 * 1024 * 1024    # under v7x 64 MiB physical; fine on v5e/v6e
_LANE_CAP = 8192                        # cap on the lane-dense last dim


def _drop_path_kernel(x_ref, s_ref, o_ref):
    # Single broadcasted vector multiply per vreg, kept in x.dtype.
    o_ref[...] = x_ref[...] * s_ref[...].astype(x_ref.dtype)


def _largest_lane_divisor(feat, cap=_LANE_CAP):
    """Largest multiple of 128 dividing `feat` that is <= cap (0 if none)."""
    best = 0
    m = 128
    top = min(feat, cap)
    while m <= top:
        if feat % m == 0:
            best = m
        m += 128
    return best


def _choose_tiles(m, n, itemsize):
    """Pick a (tile_m, tile_n) block of ~_TARGET_BLOCK_BYTES for an (m, n) array."""
    target_elems = max(8 * 128, _TARGET_BLOCK_BYTES // itemsize)
    m_min = m if m < 8 else 8
    if n * m_min <= target_elems:
        # Take the full last dim (always a legal block dim) and grow the row tile.
        tile_n = n
        tile_m = min(target_elems // max(n, 1), m)
        if tile_m < m:
            tile_m = max(8, (tile_m // 8) * 8)     # multiple of 8 when not full
    else:
        # Last dim alone exceeds the target: tile it in 128-multiple chunks
        # (edge block along the feature axis is masked by Pallas).
        tile_m = m_min
        tile_n = max(128, (target_elems // max(tile_m, 1)) // 128 * 128)
        n_ceil = -(-n // 128) * 128
        if tile_n >= n_ceil:
            tile_n = n
    return tile_m, tile_n


def npu_drop_path(x, random_tensor, keep_prob):
    """x: (B, ...); random_tensor: (B,) + (1,)*(ndim-1) uniform [0,1); keep_prob > 0."""
    if not (keep_prob > 0.0):
        raise ValueError("keep_prob must be > 0 (drop_prob < 1.0); "
                         "keep_prob == 0 divides by zero in the reference too.")

    orig_shape = x.shape
    batch = orig_shape[0]
    feat = 1
    for d in orig_shape[1:]:
        feat *= d
    itemsize = jnp.dtype(x.dtype).itemsize

    # Per-sample scale: floor(rand + keep_prob) / keep_prob (one trivial XLA op,
    # exactly the PyTorch mask semantics).
    rand = random_tensor.reshape(batch).astype(jnp.float32)
    scale = jnp.floor(rand + keep_prob) / keep_prob              # (batch,) f32

    lane = _largest_lane_divisor(feat)
    if lane:
        # Lane-dense 2D view: (batch*rows, lane), per-row scale broadcast.
        rows = feat // lane
        m, n = batch * rows, lane
        s2 = jnp.broadcast_to(scale[:, None], (batch, rows)).reshape(m, 1)
    else:
        # feat % 128 != 0: keep (batch, feat) and tile the feature axis in
        # 128-multiple chunks instead of paying a host-side pad copy.
        m, n = batch, feat
        s2 = scale[:, None]
    x2 = x.reshape(m, n)

    tile_m, tile_n = _choose_tiles(m, n, itemsize)
    grid = (pl.cdiv(m, tile_m), pl.cdiv(n, tile_n))

    out2 = pl.pallas_call(
        _drop_path_kernel,
        out_shape=jax.ShapeDtypeStruct((m, n), x.dtype),
        grid=grid,
        in_specs=[
            pl.BlockSpec((tile_m, tile_n), lambda i, j: (i, j)),
            pl.BlockSpec((tile_m, 1), lambda i, j: (i, 0)),
        ],
        out_specs=pl.BlockSpec((tile_m, tile_n), lambda i, j: (i, j)),
        compiler_params=pltpu.CompilerParams(
            dimension_semantics=("parallel", "parallel"),
            vmem_limit_bytes=_VMEM_LIMIT_BYTES,
        ),
    )(x2, s2)

    return out2.reshape(orig_shape)


class NpuDropPathJax:
    """Minimal JAX analogue of NpuDropPath: stochastic depth in training mode."""

    def __init__(self, drop_prob):
        self.drop_prob = float(drop_prob)
        self.keep_prob = 1.0 - self.drop_prob

    def __call__(self, x, random_tensor, training=True):
        if self.drop_prob == 0.0 or not training:
            return x
        return npu_drop_path(x, random_tensor, self.keep_prob)


if __name__ == "__main__":
    key = jax.random.PRNGKey(0)
    kx, kr, kx2, kr2, kx3, kr3 = jax.random.split(key, 6)

    drop_prob = 0.25
    keep_prob = 1.0 - drop_prob
    module = NpuDropPathJax(drop_prob)

    # ---- primary small shape: (B, N, D) = (2, 8, 32), float32 ----
    x = jax.random.normal(kx, (2, 8, 32), dtype=jnp.float32)
    random_tensor = jax.random.uniform(kr, (2, 1, 1), dtype=jnp.float32)
    out = jax.block_until_ready(module(x, random_tensor, training=True))
    mask = jnp.floor(random_tensor + keep_prob)
    ref = (x / keep_prob) * mask
    assert out.shape == x.shape and out.dtype == x.dtype
    assert jnp.allclose(out, ref, atol=1e-5, rtol=1e-5), "f32 mismatch vs reference"

    # ---- bfloat16 on the same shape (dtype handling on store; loose tol) ----
    xb = x.astype(jnp.bfloat16)
    outb = jax.block_until_ready(module(xb, random_tensor, training=True))
    refb = ((xb.astype(jnp.float32) / keep_prob) * mask).astype(jnp.bfloat16)
    assert outb.shape == xb.shape and outb.dtype == jnp.bfloat16
    assert jnp.allclose(outb.astype(jnp.float32), refb.astype(jnp.float32),
                        atol=1e-1, rtol=2e-2), "bf16 mismatch vs reference"

    # ---- feat % 128 != 0 fallback path: (2, 5, 30) ----
    x_u = jax.random.normal(kx2, (2, 5, 30), dtype=jnp.float32)
    r_u = jax.random.uniform(kr2, (2, 1, 1), dtype=jnp.float32)
    out_u = jax.block_until_ready(module(x_u, r_u, training=True))
    ref_u = (x_u / keep_prob) * jnp.floor(r_u + keep_prob)
    assert jnp.allclose(out_u, ref_u, atol=1e-5, rtol=1e-5), "unaligned-feat mismatch"

    # ---- multi-block grid + edge block: ViT-ish (8, 197, 768) ----
    x_v = jax.random.normal(kx3, (8, 197, 768), dtype=jnp.float32)
    r_v = jax.random.uniform(kr3, (8, 1, 1), dtype=jnp.float32)
    out_v = jax.block_until_ready(module(x_v, r_v, training=True))
    ref_v = (x_v / keep_prob) * jnp.floor(r_v + keep_prob)
    assert jnp.allclose(out_v, ref_v, atol=1e-5, rtol=1e-5), "multi-block mismatch"

    # ---- eval / drop_prob == 0 passthrough ----
    assert module(x, random_tensor, training=False) is x
    assert NpuDropPathJax(0.0)(x, random_tensor, training=True) is x

    print("KERNEL_OK")
</pallas_src>

<mosaic_0001>
module attributes {stable_mosaic.version = 11 : i64} {
  func.func @_drop_path_kernel(%arg0: i32, %arg1: i32, %arg2: memref<2x256xf32, #tpu.memory_space<vmem>>, %arg3: memref<2x1xf32, #tpu.memory_space<vmem>>, %arg4: memref<2x256xf32, #tpu.memory_space<vmem>>) attributes {dimension_semantics = [#tpu.dimension_semantics<parallel>, #tpu.dimension_semantics<parallel>], iteration_bounds = array<i64: 1, 1>, scalar_prefetch = 0 : i64, scratch_operands = 0 : i64, tpu.core_type = #tpu.core_type<tc>, window_params = [{transform_indices = @transform_0, window_bounds = array<i64: 2, 256>}, {transform_indices = @transform_1, window_bounds = array<i64: 2, 1>}, {transform_indices = @transform_2, window_bounds = array<i64: 2, 256>}]} {
    %c0 = arith.constant 0 : index
    %c0_0 = arith.constant 0 : index
    %0 = vector.load %arg2[%c0, %c0_0] : memref<2x256xf32, #tpu.memory_space<vmem>>, vector<2x256xf32>
    %c0_1 = arith.constant 0 : index
    %c0_2 = arith.constant 0 : index
    %1 = vector.load %arg3[%c0_1, %c0_2] : memref<2x1xf32, #tpu.memory_space<vmem>>, vector<2x1xf32>
    %2 = vector.broadcast %1 : vector<2x1xf32> to vector<2x256xf32>
    %3 = arith.mulf %0, %2 : vector<2x256xf32>
    %c0_3 = arith.constant 0 : index
    %c0_4 = arith.constant 0 : index
    %4 = vector.load %arg4[%c0_3, %c0_4] : memref<2x256xf32, #tpu.memory_space<vmem>>, vector<2x256xf32>
    tpu.vector_store %arg4[%c0_3, %c0_4], %3 {strides = array<i32>} : memref<2x256xf32, #tpu.memory_space<vmem>>, vector<2x256xf32>,
    return
  }
  func.func @transform_0(%arg0: i32, %arg1: i32) -> (i32, i32) {
    %c0_i32 = arith.constant 0 : i32
    return %arg0, %arg1 : i32, i32
  }
  func.func @transform_1(%arg0: i32, %arg1: i32) -> (i32, i32) {
    %c0_i32 = arith.constant 0 : i32
    %c0_i32_0 = arith.constant 0 : i32
    return %arg0, %c0_i32 : i32, i32
  }
  func.func @transform_2(%arg0: i32, %arg1: i32) -> (i32, i32) {
    %c0_i32 = arith.constant 0 : i32
    return %arg0, %arg1 : i32, i32
  }
}

</mosaic_0001>

<bundles_post_ra>
// kernel: tpu_custom_call.1
= control target key start
LH: loop header
LB: loop body
LE: loop exit
PB: predicated region body
PF: predicated region fallthrough
CT: control target
= control target key end

     0   :  { %7 = vsyncpa [#allocation3], 0  ;;  %s154_s0 = inlined_call_operand.hbm [shape: f32[2,256], index: 0, kind: input, shape index: {}]   ;;  %s155_s1 = inlined_call_operand.vmem [shape: f32[2,1], index: 1, kind: input, shape index: {}]   ;;  %s156_s2 = inlined_call_operand.hbm [shape: f32[2,256], index: 2, kind: output, shape index: {}]  }
   0x1   :  { %8 = vsyncpa [#allocation4], 0  ;;  %s108_s9 = smov [#allocation2]   ;;  %s60_s13 = scalar_lea.hbm %s154_s0, 64 }
   0x2   :  { %s15_s10 = sshll.u32 %s108_s9, 4  ;;  %p61_p0 = scmp.ne.s32.totalorder %s154_s0, %s60_s13  ;;  %s16_s10 = int_to_ptr.vmem [resolvable:$true] %s15_s10 }
   0x3   :  { %p64_p1 = scmp.lt.u32.totalorder %s60_s13, %s154_s0 }
   0x5   :  { %p66_p2 = pnand %p64_p1, %p61_p0 }
   0x7   :  { %69 = shalt.err (!%p66_p2)
}
   0x8   :  { %s70_s18 = scalar_lea.vmem %s16_s10, 64  ;;  %p75_p4 = scmp.lt.s32.totalorder %s16_s10, %s16_s10 }
   0x9   :  { %p71_p3 = scmp.ne.s32.totalorder %s16_s10, %s70_s18  ;;  %p76_p5 = scmp.lt.s32.totalorder %s70_s18, %s70_s18 }
   0xb   :  { %p77_p6 = por %p76_p5, %p75_p4 }
   0xd   :  { %p78_p7 = pnand %p77_p6, %p71_p3 }
   0xf   :  { %81 = shalt.err (!%p78_p7)
}
  0x10   :  { %18 = dma.hbm_to_vmem [thread:$0]  %s154_s0, 64, %s16_s10, [#allocation3]  }
  0x11   :  { %104 = dma.done.wait [#allocation3], 64  }
  0x12   :  { %105 = vsyncadd [#allocation3], 4294967232  ;;  %v109_v0 = vmov 0   ;;  %v25_v1 = vld [vmem:[%s155_s1] sm:$0x3]  ;;  %v33_v4 = vlaneseq  ;;  %s111_s23 = smov [#allocation5]  }
  0x13   :  { %59 = vset.pattern.permute.xlu0 %v109_v0  ;;  %v110_v2 = vmov 269488144   ;;  %v24_v9 = vld [vmem:[#allocation2] sm:$0xf]  ;;  %s46_s24 = sshll.u32 %s111_s23, 4  ;;  %s47_s24 = int_to_ptr.vmem [resolvable:$true] %s46_s24 }
  0x14   :  { %28 = vperm.xlu0 %59, %v25_v1   ;;  %v31_v3 = vunpack.c.l.s4 %v110_v2  ;;  %v34_v6 = vshrl.u32 %v33_v4, 7  ;;  %s82_s0 = scalar_lea.vmem %s47_s24, 64  ;;  %p87_p9 = scmp.lt.s32.totalorder %s47_s24, %s47_s24 }
  0x15   :  { %p83_p8 = scmp.ne.s32.totalorder %s47_s24, %s82_s0  ;;  %p88_p10 = scmp.lt.s32.totalorder %s82_s0, %s82_s0 }
  0x16   :  { %v32_v5 = vunpack.c.0.s8 %v31_v3 }
  0x17   :  { %p89_p11 = por %p88_p10, %p87_p9 }
  0x18   :  { %v35_v7 = vsub.s32 %v32_v5, %v34_v6 }
  0x19   :  { %p90_p12 = pnand %p89_p11, %p83_p8 }
  0x93   :  { %v29_v8 = vpop.permute.xlu0 %28 }
  0x94   :  { %v36_v10 = vrot.slane %v29_v8, %v35_v7 }
  0x96   :  { %v38_v11 = vmul.f32 %v36_v10, %v24_v9 }
  0x98   :  { %39 = vst [vmem:[#allocation5] sm:$0xf] %v38_v11 }
  0x99   :  { %93 = shalt.err (!%p90_p12)
}
  0x9a   :  { %s94_s26 = scalar_lea.hbm %s156_s2, 64 }
  0x9b   :  { %p95_p13 = scmp.ne.s32.totalorder %s156_s2, %s94_s26  ;;  %p98_p0 = scmp.lt.u32.totalorder %s94_s26, %s156_s2 }
  0x9d   :  { %p100_p1 = pnand %p98_p0, %p95_p13 }
  0x9f   :  { %103 = shalt.err (!%p100_p1)
}
  0xa0   :  { %49 = dma.vmem_to_hbm [thread:$0]  %s47_s24, 64, %s156_s2, [#allocation4]  }
  0xa1   :  { %106 = dma.done.wait [#allocation4], 64  }
  0xa2   :  { %107 = vsyncadd [#allocation4], 4294967232 }
  0xa3   :  { %53 = vsyncpa [#allocation3], 1 }
  0xa4   :  { %54 = vsyncpa [#allocation4], 1 }

</bundles_post_ra>
